<compile_context>
chip_gen: v7x
topology: tpu7x:2x2x1
jax: 0.10.0
libtpu: 0.0.40
codegen_flags: <defaults>
</compile_context>

<pallas_src>
import functools
import math

import jax
import jax.numpy as jnp
from jax.experimental import pallas as pl
from jax.experimental.pallas import tpu as pltpu


# --------------------------------------------------------------------------
# Kernels
# --------------------------------------------------------------------------
def _rmsnorm_kernel(x_ref, w_ref, y_ref, *, eps, inv_hidden):
    x = x_ref[...].astype(jnp.float32)
    # sum/true_hidden (not mean) so zero-padded lanes do not bias the variance.
    var = jnp.sum(x * x, axis=-1, keepdims=True) * inv_hidden
    inv = jax.lax.rsqrt(var + eps)
    normed = (x * inv).astype(x_ref.dtype)            # cast back to input dtype
    y_ref[...] = (w_ref[...] * normed).astype(y_ref.dtype)


def _add_rmsnorm_kernel(res_ref, x_ref, w_ref, y_ref, xsum_ref, *, eps, inv_hidden):
    s = res_ref[...].astype(jnp.float32) + x_ref[...].astype(jnp.float32)
    s_q = s.astype(xsum_ref.dtype)                    # round sum to input dtype
    xsum_ref[...] = s_q
    sf = s_q.astype(jnp.float32)                      # stats from rounded sum
    var = jnp.sum(sf * sf, axis=-1, keepdims=True) * inv_hidden
    inv = jax.lax.rsqrt(var + eps)
    normed = (sf * inv).astype(xsum_ref.dtype)
    y_ref[...] = (w_ref[...] * normed).astype(y_ref.dtype)


# --------------------------------------------------------------------------
# Tile selection (HBM-bound -> biggest tile that fits VMEM on every chip)
# --------------------------------------------------------------------------
_ROW_BASE = 32                      # multiple of 8/16/32 sublane packing
_MAX_ROW_TILE = 1024
_PIPE_BUDGET_BYTES = 28 * 1024 * 1024   # pipelined buffers; safe on v7x (64 MiB VMEM)
_VMEM_LIMIT_BYTES = 48 * 1024 * 1024    # raise scoped VMEM limit (16/32 MiB defaults)


def _choose_row_tile(rows, hidden_p, itemsize, n_io):
    # bytes per row: double-buffered in/out tiles + rough f32 temporaries.
    per_row = hidden_p * (2 * n_io * itemsize + 8)
    tile = max(_ROW_BASE, (_PIPE_BUDGET_BYTES // per_row) // _ROW_BASE * _ROW_BASE)
    tile = min(tile, _MAX_ROW_TILE)
    # never make a tile much bigger than the problem itself
    tile = min(tile, pl.cdiv(rows, _ROW_BASE) * _ROW_BASE)
    # keep >= ~8 grid steps on large problems so both v7x TensorCores get work
    if rows >= 8 * _ROW_BASE:
        tile = min(tile, max(_ROW_BASE, (rows // 8) // _ROW_BASE * _ROW_BASE))
    return tile


# --------------------------------------------------------------------------
# Wrapper
# --------------------------------------------------------------------------
def mixtral_rms_norm(hidden_states, weight, eps=1e-6, residual=None,
                     *, row_tile=None):
    """Returns (y, x) matching MixtralRMSNorm.forward."""
    orig_shape = hidden_states.shape
    hidden = orig_shape[-1]
    rows = math.prod(orig_shape[:-1]) if len(orig_shape) > 1 else 1

    dtype = hidden_states.dtype
    itemsize = jnp.dtype(dtype).itemsize
    n_io = 2 if residual is None else 4

    hidden_p = pl.cdiv(hidden, 128) * 128            # keep stores lane-dense
    if row_tile is None:
        row_tile = _choose_row_tile(rows, hidden_p, itemsize, n_io)
    rows_p = pl.cdiv(rows, row_tile) * row_tile

    x2d = hidden_states.reshape(rows, hidden)
    w2d = weight.reshape(1, hidden)
    pad_r, pad_h = rows_p - rows, hidden_p - hidden
    if pad_r or pad_h:
        x2d = jnp.pad(x2d, ((0, pad_r), (0, pad_h)))
    if pad_h:
        w2d = jnp.pad(w2d, ((0, 0), (0, pad_h)))

    grid = (rows_p // row_tile,)
    io_spec = pl.BlockSpec((row_tile, hidden_p), lambda i: (i, 0))
    w_spec = pl.BlockSpec((1, hidden_p), lambda i: (0, 0))
    cparams = pltpu.CompilerParams(
        dimension_semantics=("parallel",),
        vmem_limit_bytes=_VMEM_LIMIT_BYTES,
    )
    inv_hidden = 1.0 / float(hidden)

    if residual is None:
        y2d = pl.pallas_call(
            functools.partial(_rmsnorm_kernel, eps=eps, inv_hidden=inv_hidden),
            out_shape=jax.ShapeDtypeStruct((rows_p, hidden_p), dtype),
            grid_spec=pltpu.PrefetchScalarGridSpec(
                num_scalar_prefetch=0,
                grid=grid,
                in_specs=[io_spec, w_spec],
                out_specs=io_spec,
            ),
            compiler_params=cparams,
        )(x2d, w2d)
        if pad_r or pad_h:
            y2d = y2d[:rows, :hidden]
        return y2d.reshape(orig_shape), hidden_states

    r2d = residual.reshape(rows, hidden)
    if pad_r or pad_h:
        r2d = jnp.pad(r2d, ((0, pad_r), (0, pad_h)))

    y2d, xsum2d = pl.pallas_call(
        functools.partial(_add_rmsnorm_kernel, eps=eps, inv_hidden=inv_hidden),
        out_shape=(
            jax.ShapeDtypeStruct((rows_p, hidden_p), dtype),
            jax.ShapeDtypeStruct((rows_p, hidden_p), dtype),
        ),
        grid_spec=pltpu.PrefetchScalarGridSpec(
            num_scalar_prefetch=0,
            grid=grid,
            in_specs=[io_spec, io_spec, w_spec],
            out_specs=[io_spec, io_spec],
        ),
        compiler_params=cparams,
        input_output_aliases={1: 1},      # reuse hidden_states buffer for xsum
    )(r2d, x2d, w2d)
    if pad_r or pad_h:
        y2d = y2d[:rows, :hidden]
        xsum2d = xsum2d[:rows, :hidden]
    return y2d.reshape(orig_shape), xsum2d.reshape(orig_shape)


# --------------------------------------------------------------------------
# Reference + tests
# --------------------------------------------------------------------------
def _reference(hidden_states, weight, eps, residual=None):
    if residual is not None:
        hidden_states = (residual.astype(jnp.float32)
                         + hidden_states.astype(jnp.float32)).astype(hidden_states.dtype)
    x = hidden_states.astype(jnp.float32)
    var = jnp.mean(x * x, axis=-1, keepdims=True)
    normed = (x * jax.lax.rsqrt(var + eps)).astype(hidden_states.dtype)
    return (weight * normed).astype(hidden_states.dtype), hidden_states


def _check(y, x, y_ref, x_ref, atol, rtol):
    assert jnp.allclose(y.astype(jnp.float32), y_ref.astype(jnp.float32),
                        atol=atol, rtol=rtol)
    assert jnp.allclose(x.astype(jnp.float32), x_ref.astype(jnp.float32),
                        atol=atol, rtol=rtol)


if __name__ == "__main__":
    key = jax.random.PRNGKey(0)
    k1, k2, k3, k4 = jax.random.split(key, 4)
    eps = 1e-6

    # ---- Test A: float32, hidden multiple of 128, rows multiple of tile base
    batch, seq, hidden = 2, 16, 256
    x = jax.random.normal(k1, (batch, seq, hidden), dtype=jnp.float32)
    resid = jax.random.normal(k2, (batch, seq, hidden), dtype=jnp.float32)
    weight = jnp.ones((hidden,), dtype=jnp.float32)   # module init: torch.ones

    y1, x1 = mixtral_rms_norm(x, weight, eps, residual=None)
    jax.block_until_ready((y1, x1))
    y1_ref, x1_ref = _reference(x, weight, eps, residual=None)
    _check(y1, x1, y1_ref, x1_ref, atol=1e-5, rtol=1e-5)

    y2, x2 = mixtral_rms_norm(x, weight, eps, residual=resid)
    jax.block_until_ready((y2, x2))
    y2_ref, x2_ref = _reference(x, weight, eps, residual=resid)
    _check(y2, x2, y2_ref, x2_ref, atol=1e-5, rtol=1e-5)

    # ---- Test B: bf16, ragged rows (3*5) and hidden not a multiple of 128
    batch, seq, hidden = 3, 5, 200
    xb = jax.random.normal(k3, (batch, seq, hidden), dtype=jnp.bfloat16)
    rb = jax.random.normal(k4, (batch, seq, hidden), dtype=jnp.bfloat16)
    wb = jnp.ones((hidden,), dtype=jnp.bfloat16)

    y3, x3 = mixtral_rms_norm(xb, wb, eps, residual=None)
    jax.block_until_ready((y3, x3))
    y3_ref, x3_ref = _reference(xb, wb, eps, residual=None)
    _check(y3, x3, y3_ref, x3_ref, atol=2e-2, rtol=2e-2)

    y4, x4 = mixtral_rms_norm(xb, wb, eps, residual=rb)
    jax.block_until_ready((y4, x4))
    y4_ref, x4_ref = _reference(xb, wb, eps, residual=rb)
    _check(y4, x4, y4_ref, x4_ref, atol=2e-2, rtol=2e-2)

    print("KERNEL_OK")
</pallas_src>

<mosaic_0001>
module attributes {stable_mosaic.version = 11 : i64} {
  func.func @_rmsnorm_kernel(%arg0: i32, %arg1: memref<32x256xf32, #tpu.memory_space<vmem>>, %arg2: memref<1x256xf32, #tpu.memory_space<vmem>>, %arg3: memref<32x256xf32, #tpu.memory_space<vmem>>) attributes {dimension_semantics = [#tpu.dimension_semantics<parallel>], iteration_bounds = array<i64: 1>, scalar_prefetch = 0 : i64, scratch_operands = 0 : i64, tpu.core_type = #tpu.core_type<tc>, window_params = [{transform_indices = @transform_0, window_bounds = array<i64: 32, 256>}, {pipeline_mode = #tpu.pipeline_mode<synchronous>, transform_indices = @transform_1, window_bounds = array<i64: 1, 256>}, {transform_indices = @transform_2, window_bounds = array<i64: 32, 256>}]} {
    %c0 = arith.constant 0 : index
    %c0_0 = arith.constant 0 : index
    %0 = vector.load %arg1[%c0, %c0_0] : memref<32x256xf32, #tpu.memory_space<vmem>>, vector<32x256xf32>
    %1 = arith.mulf %0, %0 : vector<32x256xf32>
    %cst = arith.constant dense<0.000000e+00> : vector<32xf32>
    %2 = vector.multi_reduction <add>, %1, %cst [1] : vector<32x256xf32> to vector<32xf32>
    %3 = vector.shape_cast %2 : vector<32xf32> to vector<32x1xf32>
    %cst_1 = arith.constant 3.906250e-03 : f32
    %4 = vector.broadcast %cst_1 : f32 to vector<32x1xf32>
    %5 = arith.mulf %3, %4 : vector<32x1xf32>
    %cst_2 = arith.constant 9.99999997E-7 : f32
    %6 = vector.broadcast %cst_2 : f32 to vector<32x1xf32>
    %7 = arith.addf %5, %6 : vector<32x1xf32>
    %8 = math.rsqrt %7 : vector<32x1xf32>
    %9 = vector.broadcast %8 : vector<32x1xf32> to vector<32x256xf32>
    %10 = arith.mulf %0, %9 : vector<32x256xf32>
    %c0_3 = arith.constant 0 : index
    %c0_4 = arith.constant 0 : index
    %11 = vector.load %arg2[%c0_3, %c0_4] : memref<1x256xf32, #tpu.memory_space<vmem>>, vector<1x256xf32>
    %12 = vector.broadcast %11 : vector<1x256xf32> to vector<32x256xf32>
    %13 = arith.mulf %12, %10 : vector<32x256xf32>
    %c0_5 = arith.constant 0 : index
    %c0_6 = arith.constant 0 : index
    %14 = vector.load %arg3[%c0_5, %c0_6] : memref<32x256xf32, #tpu.memory_space<vmem>>, vector<32x256xf32>
    tpu.vector_store %arg3[%c0_5, %c0_6], %13 {strides = array<i32>} : memref<32x256xf32, #tpu.memory_space<vmem>>, vector<32x256xf32>,
    return
  }
  func.func @transform_0(%arg0: i32) -> (i32, i32) {
    %c0_i32 = arith.constant 0 : i32
    %c0_i32_0 = arith.constant 0 : i32
    return %arg0, %c0_i32 : i32, i32
  }
  func.func @transform_1(%arg0: i32) -> (i32, i32) {
    %c0_i32 = arith.constant 0 : i32
    %c0_i32_0 = arith.constant 0 : i32
    %c0_i32_1 = arith.constant 0 : i32
    return %c0_i32, %c0_i32_0 : i32, i32
  }
  func.func @transform_2(%arg0: i32) -> (i32, i32) {
    %c0_i32 = arith.constant 0 : i32
    %c0_i32_0 = arith.constant 0 : i32
    return %arg0, %c0_i32 : i32, i32
  }
}

</mosaic_0001>

<bundles_post_ra>
// kernel: tpu_custom_call.1
= control target key start
LH: loop header
LB: loop body
LE: loop exit
PB: predicated region body
PF: predicated region fallthrough
CT: control target
= control target key end

     0   :  { %7 = vsyncpa [#allocation3], 0  ;;  %s231_s0 = inlined_call_operand.hbm [shape: f32[32,256], index: 0, kind: input, shape index: {}]   ;;  %s232_s1 = inlined_call_operand.vmem [shape: f32[1,256], index: 1, kind: input, shape index: {}]   ;;  %s233_s2 = inlined_call_operand.hbm [shape: f32[32,256], index: 2, kind: output, shape index: {}]  }
   0x1   :  { %8 = vsyncpa [#allocation4], 0  ;;  %s179_s9 = smov [#allocation2]   ;;  %s131_s13 = scalar_lea.hbm %s231_s0, 1024 }
   0x2   :  { %s14_s10 = sshll.u32 %s179_s9, 4  ;;  %p132_p0 = scmp.ne.s32.totalorder %s231_s0, %s131_s13  ;;  %s15_s10 = int_to_ptr.vmem [resolvable:$true] %s14_s10 }
   0x3   :  { %p135_p1 = scmp.lt.u32.totalorder %s131_s13, %s231_s0 }
   0x5   :  { %p137_p2 = pnand %p135_p1, %p132_p0 }
   0x7   :  { %140 = shalt.err (!%p137_p2)
}
   0x8   :  { %s141_s18 = scalar_lea.vmem %s15_s10, 1024  ;;  %p146_p4 = scmp.lt.s32.totalorder %s15_s10, %s15_s10 }
   0x9   :  { %p142_p3 = scmp.ne.s32.totalorder %s15_s10, %s141_s18  ;;  %p147_p5 = scmp.lt.s32.totalorder %s141_s18, %s141_s18 }
   0xb   :  { %p148_p6 = por %p147_p5, %p146_p4 }
   0xd   :  { %p149_p7 = pnand %p148_p6, %p142_p3 }
   0xf   :  { %152 = shalt.err (!%p149_p7)
}
  0x10   :  { %s180_s19 = smov 256   ;;  %s181_s20 = smov 16  }
  0x11   :  { %20 = dma.hbm_to_vmem [thread:$0]  %s231_s0, 1024, %s15_s10, [#allocation3], %s180_s19, %s180_s19, %s181_s20  }
  0x12   :  { %175 = dma.done.wait [#allocation3], 1024  }
  0x13   :  { %176 = vsyncadd [#allocation3], 4294966272  ;;  %v30_v0 = vld [vmem:[#allocation2 + $0x20] sm:$0xff]  ;;  %v31_v1 = vld [vmem:[#allocation2 + $0x28] sm:$0xff]  ;;  %v76_v23 = vlaneseq  ;;  %s182_s24 = smov [#allocation5]  }
  0x14   :  { %v26_v2 = vld [vmem:[#allocation2] sm:$0xff]  ;;  %v38_v3 = vmul.f32 %v30_v0, %v30_v0  ;;  %v39_v4 = vmul.f32 %v31_v1, %v31_v1  ;;  %v27_v5 = vld [vmem:[#allocation2 + $0x8] sm:$0xff]  ;;  %v32_v7 = vld [vmem:[#allocation2 + $0x30] sm:$0xff] }
  0x15   :  { %v34_v6 = vmul.f32 %v26_v2, %v26_v2  ;;  %v33_v8 = vld [vmem:[#allocation2 + $0x38] sm:$0xff]  ;;  %v35_v9 = vmul.f32 %v27_v5, %v27_v5  ;;  %v40_v10 = vmul.f32 %v32_v7, %v32_v7  ;;  %v28_v12 = vld [vmem:[#allocation2 + $0x10] sm:$0xff]  ;;  %v77_v30 = vshrl.u32 %v76_v23, 7  ;;  %v74_v36 = vld [vmem:[%s232_s1] sm:$0x3]  ;;  %s107_s1 = sshll.u32 %s182_s24, 4  ;;  %s108_s1 = int_to_ptr.vmem [resolvable:$true] %s107_s1 }
  0x16   :  { %v41_v11 = vmul.f32 %v33_v8, %v33_v8  ;;  %v29_v13 = vld [vmem:[#allocation2 + $0x18] sm:$0xff]  ;;  %v48_v14 = vadd.f32 %v39_v4, %v38_v3  ;;  %v36_v15 = vmul.f32 %v28_v12, %v28_v12  ;;  %s153_s25 = scalar_lea.vmem %s108_s1, 1024  ;;  %p158_p9 = scmp.lt.s32.totalorder %s108_s1, %s108_s1 }
  0x17   :  { %v37_v16 = vmul.f32 %v29_v13, %v29_v13  ;;  %v42_v17 = vadd.f32 %v35_v9, %v34_v6  ;;  %v78_v34 = vsub.s32 0, %v77_v30  ;;  %v82_v35 = vsub.s32 1, %v77_v30  ;;  %p154_p8 = scmp.ne.s32.totalorder %s108_s1, %s153_s25  ;;  %p159_p10 = scmp.lt.s32.totalorder %s153_s25, %s153_s25 }
  0x18   :  { %49 = vadd.xlane.f32.xlu1 %v48_v14  ;;  %v51_v18 = vadd.f32 %v41_v11, %v40_v10 }
  0x19   :  { %43 = vadd.xlane.f32.xlu0 %v42_v17  ;;  %v45_v19 = vadd.f32 %v37_v16, %v36_v15  ;;  %v79_v37 = vrot.slane %v74_v36, %v78_v34  ;;  %v83_v38 = vrot.slane %v74_v36, %v82_v35  ;;  %p160_p11 = por %p159_p10, %p158_p9 }
  0x1b   :  { %p161_p12 = pnand %p160_p11, %p154_p8 }
  0x1c   :  { %52 = vadd.xlane.f32.xlu1 %v51_v18 }
  0x1d   :  { %46 = vadd.xlane.f32.xlu0 %v45_v19 }
  0xa5   :  { %v50_v20 = vpop.xlane.xlu1 %49 }
  0xa6   :  { %v56_v21 = vmul.f32 0.00390625, %v50_v20  ;;  %v44_v22 = vpop.xlane.xlu0 %43 }
  0xa7   :  { %v54_v24 = vmul.f32 0.00390625, %v44_v22 }
  0xa8   :  { %v60_v25 = vadd.f32 1e-06, %v56_v21 }
  0xa9   :  { %v58_v26 = vadd.f32 1e-06, %v54_v24  ;;  %v53_v27 = vpop.xlane.xlu1 %52 }
  0xaa   :  { %123 = vrsqrt.f32 %v60_v25  ;;  %v57_v28 = vmul.f32 0.00390625, %v53_v27  ;;  %v47_v29 = vpop.xlane.xlu0 %46 }
  0xab   :  { %125 = vrsqrt.f32 %v58_v26  ;;  %v55_v31 = vmul.f32 0.00390625, %v47_v29 }
  0xac   :  { %v61_v32 = vadd.f32 1e-06, %v57_v28 }
  0xad   :  { %v59_v33 = vadd.f32 1e-06, %v55_v31 }
  0xae   :  { %127 = vrsqrt.f32 %v61_v32 }
  0xaf   :  { %129 = vrsqrt.f32 %v59_v33 }
  0xb4   :  { %v124_v39 = vpop.eup %123 }
  0xb5   :  { %v126_v40 = vpop.eup %125  ;;  %v70_v41 = vmul.f32 %v124_v39, %v30_v0  ;;  %v71_v42 = vmul.f32 %v124_v39, %v31_v1 }
  0xb6   :  { %v66_v43 = vmul.f32 %v126_v40, %v26_v2  ;;  %v67_v44 = vmul.f32 %v126_v40, %v27_v5 }
  0xb7   :  { %v90_v45 = vmul.f32 %v79_v37, %v70_v41  ;;  %v91_v46 = vmul.f32 %v83_v38, %v71_v42 }
  0xb8   :  { %v128_v47 = vpop.eup %127  ;;  %v86_v48 = vmul.f32 %v79_v37, %v66_v43  ;;  %v87_v49 = vmul.f32 %v83_v38, %v67_v44 }
  0xb9   :  { %v130_v50 = vpop.eup %129  ;;  %98 = vst [vmem:[#allocation5 + $0x20] sm:$0xff] %v90_v45  ;;  %99 = vst [vmem:[#allocation5 + $0x28] sm:$0xff] %v91_v46  ;;  %v72_v51 = vmul.f32 %v128_v47, %v32_v7  ;;  %v73_v52 = vmul.f32 %v128_v47, %v33_v8 }
  0xba   :  { %94 = vst [vmem:[#allocation5] sm:$0xff] %v86_v48  ;;  %95 = vst [vmem:[#allocation5 + $0x8] sm:$0xff] %v87_v49  ;;  %v68_v53 = vmul.f32 %v130_v50, %v28_v12  ;;  %v69_v54 = vmul.f32 %v130_v50, %v29_v13 }
  0xbb   :  { %v92_v55 = vmul.f32 %v79_v37, %v72_v51  ;;  %v93_v56 = vmul.f32 %v83_v38, %v73_v52 }
  0xbc   :  { %v88_v57 = vmul.f32 %v79_v37, %v68_v53  ;;  %v89_v58 = vmul.f32 %v83_v38, %v69_v54 }
  0xbd   :  { %100 = vst [vmem:[#allocation5 + $0x30] sm:$0xff] %v92_v55  ;;  %101 = vst [vmem:[#allocation5 + $0x38] sm:$0xff] %v93_v56 }
  0xbe   :  { %96 = vst [vmem:[#allocation5 + $0x10] sm:$0xff] %v88_v57  ;;  %97 = vst [vmem:[#allocation5 + $0x18] sm:$0xff] %v89_v58 }
  0xbf   :  { %164 = shalt.err (!%p161_p12)
}
  0xc0   :  { %s165_s28 = scalar_lea.hbm %s233_s2, 1024 }
  0xc1   :  { %p166_p13 = scmp.ne.s32.totalorder %s233_s2, %s165_s28  ;;  %p169_p0 = scmp.lt.u32.totalorder %s165_s28, %s233_s2 }
  0xc3   :  { %p171_p1 = pnand %p169_p0, %p166_p13 }
  0xc5   :  { %174 = shalt.err (!%p171_p1)
}
  0xc6   :  { %113 = dma.vmem_to_hbm [thread:$0]  %s108_s1, 1024, %s233_s2, [#allocation4], %s180_s19, %s180_s19, %s181_s20  }
  0xc7   :  { %177 = dma.done.wait [#allocation4], 1024  }
  0xc8   :  { %178 = vsyncadd [#allocation4], 4294966272 }
  0xc9   :  { %117 = vsyncpa [#allocation3], 1 }
  0xca   :  { %118 = vsyncpa [#allocation4], 1 }

</bundles_post_ra>
